<compile_context>
chip_gen: v6e
topology: v6e:2x2x1
jax: 0.10.0
libtpu: 0.0.40
codegen_flags: <defaults>
</compile_context>

<pallas_src>
import jax
import jax.numpy as jnp
from jax import lax
from jax.experimental import pallas as pl
from jax.experimental.pallas import tpu as pltpu


def resblock_kernel(x_ref, w1_ref, b1_ref, w2_ref, b2_ref, o_ref, pad_ref):
    # x_ref:   (B, H, L)   lane-padded activations (interior lanes [0, W*C),
    #                       halo/pad lanes arrive zero from the host)
    # w*_ref:  (3, L, L)    block-Toeplitz conv weights (one (L, L) per dy)
    # b*_ref:  (1, L)       bias tiled over interior lanes, zero elsewhere
    # o_ref:   (B, H, L)
    # pad_ref: VMEM (R0+H+2, L) f32 padded-activation scratch; interior rows
    #          start at R0 + 1 == 8 (sublane-aligned full-lane stores).
    B, H, L = x_ref.shape
    R0 = pad_ref.shape[0] - H - 2

    # Zero the two halo ROWS once per grid step.  The interior is fully
    # overwritten before every read (so this is safe under any grid order /
    # core split), and halo COLUMNS stay zero automatically: input lanes
    # >= W*C are zero, Toeplitz output columns + bias at those lanes are zero.
    zrow = jnp.zeros((1, L), jnp.float32)
    pad_ref[R0:R0 + 1, :] = zrow                  # top halo row
    pad_ref[R0 + H + 1:R0 + H + 2, :] = zrow      # bottom halo row

    def conv3x3(w_ref, b_ref):
        # 3 lane-dense MXU matmuls (M=H, K=L, N=L); taps are contiguous
        # full-width row slices of the padded buffer (no lane shifts).
        acc = jnp.dot(pad_ref[R0:R0 + H, :], w_ref[0],
                      preferred_element_type=jnp.float32)
        acc += jnp.dot(pad_ref[R0 + 1:R0 + 1 + H, :], w_ref[1],
                       preferred_element_type=jnp.float32)
        acc += jnp.dot(pad_ref[R0 + 2:R0 + 2 + H, :], w_ref[2],
                       preferred_element_type=jnp.float32)
        return acc + b_ref[...]                    # (1, L) broadcast, hoisted

    # B is a trace-time constant (images per grid step); small, unrolled.
    for b in range(B):
        x = x_ref[b]                                               # (H, L)
        # out1 = conv1(relu(x)): interior store at lane 0, sublane row 8.
        pad_ref[R0 + 1:R0 + 1 + H, :] = jnp.maximum(x, 0.0).astype(jnp.float32)
        out1 = conv3x3(w1_ref, b1_ref)
        # out2 = conv2(relu(out1)): intermediate staged via the same scratch.
        pad_ref[R0 + 1:R0 + 1 + H, :] = jnp.maximum(out1, 0.0)
        out2 = conv3x3(w2_ref, b2_ref)
        # residual add (identity is the pre-ReLU input); 128-lane store.
        o_ref[b] = (out2 + x).astype(o_ref.dtype)


def _toeplitz_weights(w_hwio, W, C, L):
    """(3, 3, Ci, Co) HWIO -> (3, L, L) block-Toeplitz (one matrix per dy).

    Input-lane order : [0, W*C) interior (w*C + ci), [W*C, W*C+C) left halo,
                       [W*C+C, W*C+2C) right halo, rest zero rows.
    Output-lane order: [0, W*C) interior (w*C + co), rest zero columns.
    """
    w = w_hwio.astype(jnp.float32)
    WC = W * C
    wi = jnp.arange(W)
    dx = wi[:, None] - wi[None, :] + 1                       # (W_in, W_out)
    valid = ((dx >= 0) & (dx <= 2)).astype(jnp.float32)
    dxc = jnp.clip(dx, 0, 2)
    Tint = w[:, dxc] * valid[None, :, :, None, None]         # (3, Win, Wout, Ci, Co)
    Tint = Tint.transpose(0, 1, 3, 2, 4).reshape(3, WC, WC)
    T = jnp.zeros((3, L, L), jnp.float32)
    T = T.at[:, :WC, :WC].set(Tint)
    T = T.at[:, WC:WC + C, 0:C].set(w[:, 0])                 # left halo -> w_out=0, dx=0
    T = T.at[:, WC + C:WC + 2 * C, WC - C:WC].set(w[:, 2])   # right halo -> w_out=W-1, dx=2
    return T


def _pad_bias(b, W, C, L):
    bt = jnp.tile(b.reshape(1, C).astype(jnp.float32), (1, W))   # (1, W*C)
    return jnp.pad(bt, ((0, 0), (0, L - W * C)))


def residual_block_type2(x_nhwc, w1, b1, w2, b2):
    """x_nhwc: (N, H, W, C); w*: (3, 3, C, C) HWIO; b*: (1, C)."""
    N, H, W, C = x_nhwc.shape
    assert w1.shape == (3, 3, C, C) and w2.shape == (3, 3, C, C)  # in_ch == out_ch
    WC = W * C
    L = max(128, pl.cdiv(WC + 2 * C, 128) * 128)   # 128-lane-aligned width
    R0 = 7                                          # interior rows start at 8

    x2d = x_nhwc.reshape(N, H, WC)
    xL = jnp.pad(x2d, ((0, 0), (0, 0), (0, L - WC)))     # zero halo/pad lanes

    w1t = _toeplitz_weights(w1, W, C, L)
    w2t = _toeplitz_weights(w2, W, C, L)
    b1t = _pad_bias(b1, W, C, L)
    b2t = _pad_bias(b2, W, C, L)

    # 2 parallel grid steps when possible (one per v7x TensorCore); each step
    # processes N // num_steps images in-kernel to amortize per-step overhead.
    num_steps = 2 if (N >= 2 and N % 2 == 0) else 1
    Bb = N // num_steps

    outL = pl.pallas_call(
        resblock_kernel,
        out_shape=jax.ShapeDtypeStruct((N, H, L), x_nhwc.dtype),
        grid_spec=pltpu.PrefetchScalarGridSpec(
            num_scalar_prefetch=0,
            grid=(num_steps,),
            in_specs=[
                pl.BlockSpec((Bb, H, L), lambda n: (n, 0, 0)),
                pl.BlockSpec((3, L, L), lambda n: (0, 0, 0)),
                pl.BlockSpec((1, L), lambda n: (0, 0)),
                pl.BlockSpec((3, L, L), lambda n: (0, 0, 0)),
                pl.BlockSpec((1, L), lambda n: (0, 0)),
            ],
            out_specs=pl.BlockSpec((Bb, H, L), lambda n: (n, 0, 0)),
            scratch_shapes=[pltpu.VMEM((R0 + H + 2, L), jnp.float32)],
        ),
        compiler_params=pltpu.CompilerParams(
            dimension_semantics=("parallel",),
            vmem_limit_bytes=32 * 1024 * 1024,
        ),
    )(xL, w1t, b1t, w2t, b2t)
    return outL[:, :, :WC].reshape(N, H, W, C)


def reference_block(x_nhwc, w1, b1, w2, b2):
    """Pure-JAX reference (matches PyTorch ResidualBlockType2 semantics)."""
    dn = ("NHWC", "HWIO", "NHWC")
    pad = ((1, 1), (1, 1))
    out = jax.nn.relu(x_nhwc)
    out = lax.conv_general_dilated(out, w1, (1, 1), pad, dimension_numbers=dn) + b1
    out = jax.nn.relu(out)
    out = lax.conv_general_dilated(out, w2, (1, 1), pad, dimension_numbers=dn) + b2
    return out + x_nhwc


if __name__ == "__main__":
    N, H, W, C = 2, 16, 16, 4  # in_ch == out_ch == C (asserted in the module)

    key = jax.random.PRNGKey(0)
    kx, kw1, kb1, kw2, kb2 = jax.random.split(key, 5)

    x = jax.random.normal(kx, (N, H, W, C), dtype=jnp.float32)
    w1 = jax.random.normal(kw1, (3, 3, C, C), dtype=jnp.float32) * 0.1
    b1 = jax.random.normal(kb1, (1, C), dtype=jnp.float32) * 0.1
    w2 = jax.random.normal(kw2, (3, 3, C, C), dtype=jnp.float32) * 0.1
    b2 = jax.random.normal(kb2, (1, C), dtype=jnp.float32) * 0.1

    out = residual_block_type2(x, w1, b1, w2, b2)
    out = jax.block_until_ready(out)

    ref = reference_block(x, w1, b1, w2, b2)
    if not jnp.allclose(out, ref, atol=1e-4, rtol=1e-4):
        raise AssertionError(
            f"Pallas output mismatch, max abs err = {jnp.max(jnp.abs(out - ref))}"
        )

    print("KERNEL_OK")
</pallas_src>

<mosaic_0001>
module attributes {stable_mosaic.version = 11 : i64} {
  func.func @resblock_kernel(%arg0: i32, %arg1: memref<1x16x128xf32, #tpu.memory_space<vmem>>, %arg2: memref<3x128x128xf32, #tpu.memory_space<vmem>>, %arg3: memref<1x128xf32, #tpu.memory_space<vmem>>, %arg4: memref<3x128x128xf32, #tpu.memory_space<vmem>>, %arg5: memref<1x128xf32, #tpu.memory_space<vmem>>, %arg6: memref<1x16x128xf32, #tpu.memory_space<vmem>>, %arg7: memref<25x128xf32, #tpu.memory_space<vmem>>) attributes {dimension_semantics = [#tpu.dimension_semantics<parallel>], iteration_bounds = array<i64: 2>, scalar_prefetch = 0 : i64, scratch_operands = 1 : i64, tpu.core_type = #tpu.core_type<tc>, window_params = [{transform_indices = @transform_0, window_bounds = array<i64: 1, 16, 128>}, {pipeline_mode = #tpu.pipeline_mode<synchronous>, transform_indices = @transform_1, window_bounds = array<i64: 3, 128, 128>}, {pipeline_mode = #tpu.pipeline_mode<synchronous>, transform_indices = @transform_2, window_bounds = array<i64: 1, 128>}, {pipeline_mode = #tpu.pipeline_mode<synchronous>, transform_indices = @transform_3, window_bounds = array<i64: 3, 128, 128>}, {pipeline_mode = #tpu.pipeline_mode<synchronous>, transform_indices = @transform_4, window_bounds = array<i64: 1, 128>}, {transform_indices = @transform_5, window_bounds = array<i64: 1, 16, 128>}]} {
    %cst = arith.constant 0.000000e+00 : f32
    %0 = vector.broadcast %cst : f32 to vector<1x128xf32>
    %c7 = arith.constant 7 : index
    %c0 = arith.constant 0 : index
    %1 = vector.load %arg7[%c7, %c0] : memref<25x128xf32, #tpu.memory_space<vmem>>, vector<1x128xf32>
    tpu.vector_store %arg7[%c7, %c0], %0 {strides = array<i32>} : memref<25x128xf32, #tpu.memory_space<vmem>>, vector<1x128xf32>,
    %c24 = arith.constant 24 : index
    %c0_0 = arith.constant 0 : index
    %2 = vector.load %arg7[%c24, %c0_0] : memref<25x128xf32, #tpu.memory_space<vmem>>, vector<1x128xf32>
    tpu.vector_store %arg7[%c24, %c0_0], %0 {strides = array<i32>} : memref<25x128xf32, #tpu.memory_space<vmem>>, vector<1x128xf32>,
    %c0_1 = arith.constant 0 : index
    %c0_2 = arith.constant 0 : index
    %c0_3 = arith.constant 0 : index
    %3 = vector.load %arg1[%c0_1, %c0_2, %c0_3] : memref<1x16x128xf32, #tpu.memory_space<vmem>>, vector<1x16x128xf32>
    %4 = vector.shape_cast %3 : vector<1x16x128xf32> to vector<16x128xf32>
    %cst_4 = arith.constant 0.000000e+00 : f32
    %5 = vector.broadcast %cst_4 : f32 to vector<16x128xf32>
    %6 = arith.maximumf %4, %5 : vector<16x128xf32>
    %c8 = arith.constant 8 : index
    %c0_5 = arith.constant 0 : index
    %7 = vector.load %arg7[%c8, %c0_5] : memref<25x128xf32, #tpu.memory_space<vmem>>, vector<16x128xf32>
    tpu.vector_store %arg7[%c8, %c0_5], %6 {strides = array<i32>} : memref<25x128xf32, #tpu.memory_space<vmem>>, vector<16x128xf32>,
    %c7_6 = arith.constant 7 : index
    %c0_7 = arith.constant 0 : index
    %8 = vector.load %arg7[%c7_6, %c0_7] : memref<25x128xf32, #tpu.memory_space<vmem>>, vector<16x128xf32>
    %c0_8 = arith.constant 0 : index
    %c0_9 = arith.constant 0 : index
    %c0_10 = arith.constant 0 : index
    %9 = vector.load %arg2[%c0_8, %c0_9, %c0_10] : memref<3x128x128xf32, #tpu.memory_space<vmem>>, vector<1x128x128xf32>
    %10 = vector.shape_cast %9 : vector<1x128x128xf32> to vector<128x128xf32>
    %cst_11 = arith.constant dense<0.000000e+00> : vector<16x128xf32>
    %11 = tpu.matmul %8, %10, %cst_11 {dimension_numbers = #tpu.dot_dimension_numbers<[1], [0], [0], [1], [0, 0, 1, 1], [], []>} : vector<16x128xf32>, vector<128x128xf32>, vector<16x128xf32> -> vector<16x128xf32>
    %c8_12 = arith.constant 8 : index
    %c0_13 = arith.constant 0 : index
    %12 = vector.load %arg7[%c8_12, %c0_13] : memref<25x128xf32, #tpu.memory_space<vmem>>, vector<16x128xf32>
    %c1 = arith.constant 1 : index
    %c0_14 = arith.constant 0 : index
    %c0_15 = arith.constant 0 : index
    %13 = vector.load %arg2[%c1, %c0_14, %c0_15] : memref<3x128x128xf32, #tpu.memory_space<vmem>>, vector<1x128x128xf32>
    %14 = vector.shape_cast %13 : vector<1x128x128xf32> to vector<128x128xf32>
    %cst_16 = arith.constant dense<0.000000e+00> : vector<16x128xf32>
    %15 = tpu.matmul %12, %14, %cst_16 {dimension_numbers = #tpu.dot_dimension_numbers<[1], [0], [0], [1], [0, 0, 1, 1], [], []>} : vector<16x128xf32>, vector<128x128xf32>, vector<16x128xf32> -> vector<16x128xf32>
    %16 = arith.addf %11, %15 : vector<16x128xf32>
    %c9 = arith.constant 9 : index
    %c0_17 = arith.constant 0 : index
    %17 = vector.load %arg7[%c9, %c0_17] : memref<25x128xf32, #tpu.memory_space<vmem>>, vector<16x128xf32>
    %c2 = arith.constant 2 : index
    %c0_18 = arith.constant 0 : index
    %c0_19 = arith.constant 0 : index
    %18 = vector.load %arg2[%c2, %c0_18, %c0_19] : memref<3x128x128xf32, #tpu.memory_space<vmem>>, vector<1x128x128xf32>
    %19 = vector.shape_cast %18 : vector<1x128x128xf32> to vector<128x128xf32>
    %cst_20 = arith.constant dense<0.000000e+00> : vector<16x128xf32>
    %20 = tpu.matmul %17, %19, %cst_20 {dimension_numbers = #tpu.dot_dimension_numbers<[1], [0], [0], [1], [0, 0, 1, 1], [], []>} : vector<16x128xf32>, vector<128x128xf32>, vector<16x128xf32> -> vector<16x128xf32>
    %21 = arith.addf %16, %20 : vector<16x128xf32>
    %c0_21 = arith.constant 0 : index
    %c0_22 = arith.constant 0 : index
    %22 = vector.load %arg3[%c0_21, %c0_22] : memref<1x128xf32, #tpu.memory_space<vmem>>, vector<1x128xf32>
    %23 = vector.broadcast %22 : vector<1x128xf32> to vector<16x128xf32>
    %24 = arith.addf %21, %23 : vector<16x128xf32>
    %cst_23 = arith.constant 0.000000e+00 : f32
    %25 = vector.broadcast %cst_23 : f32 to vector<16x128xf32>
    %26 = arith.maximumf %24, %25 : vector<16x128xf32>
    %c8_24 = arith.constant 8 : index
    %c0_25 = arith.constant 0 : index
    %27 = vector.load %arg7[%c8_24, %c0_25] : memref<25x128xf32, #tpu.memory_space<vmem>>, vector<16x128xf32>
    tpu.vector_store %arg7[%c8_24, %c0_25], %26 {strides = array<i32>} : memref<25x128xf32, #tpu.memory_space<vmem>>, vector<16x128xf32>,
    %c7_26 = arith.constant 7 : index
    %c0_27 = arith.constant 0 : index
    %28 = vector.load %arg7[%c7_26, %c0_27] : memref<25x128xf32, #tpu.memory_space<vmem>>, vector<16x128xf32>
    %c0_28 = arith.constant 0 : index
    %c0_29 = arith.constant 0 : index
    %c0_30 = arith.constant 0 : index
    %29 = vector.load %arg4[%c0_28, %c0_29, %c0_30] : memref<3x128x128xf32, #tpu.memory_space<vmem>>, vector<1x128x128xf32>
    %30 = vector.shape_cast %29 : vector<1x128x128xf32> to vector<128x128xf32>
    %cst_31 = arith.constant dense<0.000000e+00> : vector<16x128xf32>
    %31 = tpu.matmul %28, %30, %cst_31 {dimension_numbers = #tpu.dot_dimension_numbers<[1], [0], [0], [1], [0, 0, 1, 1], [], []>} : vector<16x128xf32>, vector<128x128xf32>, vector<16x128xf32> -> vector<16x128xf32>
    %c8_32 = arith.constant 8 : index
    %c0_33 = arith.constant 0 : index
    %32 = vector.load %arg7[%c8_32, %c0_33] : memref<25x128xf32, #tpu.memory_space<vmem>>, vector<16x128xf32>
    %c1_34 = arith.constant 1 : index
    %c0_35 = arith.constant 0 : index
    %c0_36 = arith.constant 0 : index
    %33 = vector.load %arg4[%c1_34, %c0_35, %c0_36] : memref<3x128x128xf32, #tpu.memory_space<vmem>>, vector<1x128x128xf32>
    %34 = vector.shape_cast %33 : vector<1x128x128xf32> to vector<128x128xf32>
    %cst_37 = arith.constant dense<0.000000e+00> : vector<16x128xf32>
    %35 = tpu.matmul %32, %34, %cst_37 {dimension_numbers = #tpu.dot_dimension_numbers<[1], [0], [0], [1], [0, 0, 1, 1], [], []>} : vector<16x128xf32>, vector<128x128xf32>, vector<16x128xf32> -> vector<16x128xf32>
    %36 = arith.addf %31, %35 : vector<16x128xf32>
    %c9_38 = arith.constant 9 : index
    %c0_39 = arith.constant 0 : index
    %37 = vector.load %arg7[%c9_38, %c0_39] : memref<25x128xf32, #tpu.memory_space<vmem>>, vector<16x128xf32>
    %c2_40 = arith.constant 2 : index
    %c0_41 = arith.constant 0 : index
    %c0_42 = arith.constant 0 : index
    %38 = vector.load %arg4[%c2_40, %c0_41, %c0_42] : memref<3x128x128xf32, #tpu.memory_space<vmem>>, vector<1x128x128xf32>
    %39 = vector.shape_cast %38 : vector<1x128x128xf32> to vector<128x128xf32>
    %cst_43 = arith.constant dense<0.000000e+00> : vector<16x128xf32>
    %40 = tpu.matmul %37, %39, %cst_43 {dimension_numbers = #tpu.dot_dimension_numbers<[1], [0], [0], [1], [0, 0, 1, 1], [], []>} : vector<16x128xf32>, vector<128x128xf32>, vector<16x128xf32> -> vector<16x128xf32>
    %41 = arith.addf %36, %40 : vector<16x128xf32>
    %c0_44 = arith.constant 0 : index
    %c0_45 = arith.constant 0 : index
    %42 = vector.load %arg5[%c0_44, %c0_45] : memref<1x128xf32, #tpu.memory_space<vmem>>, vector<1x128xf32>
    %43 = vector.broadcast %42 : vector<1x128xf32> to vector<16x128xf32>
    %44 = arith.addf %41, %43 : vector<16x128xf32>
    %45 = arith.addf %44, %4 : vector<16x128xf32>
    %c0_46 = arith.constant 0 : index
    %c0_47 = arith.constant 0 : index
    %c0_48 = arith.constant 0 : index
    %46 = vector.load %arg6[%c0_46, %c0_47, %c0_48] : memref<1x16x128xf32, #tpu.memory_space<vmem>>, vector<1x16x128xf32>
    %47 = vector.shape_cast %46 : vector<1x16x128xf32> to vector<16x128xf32>
    %48 = vector.shape_cast %45 : vector<16x128xf32> to vector<1x16x128xf32>
    tpu.vector_store %arg6[%c0_46, %c0_47, %c0_48], %48 {strides = array<i32>} : memref<1x16x128xf32, #tpu.memory_space<vmem>>, vector<1x16x128xf32>,
    return
  }
  func.func @transform_0(%arg0: i32) -> (i32, i32, i32) {
    %c0_i32 = arith.constant 0 : i32
    %c0_i32_0 = arith.constant 0 : i32
    %c0_i32_1 = arith.constant 0 : i32
    return %arg0, %c0_i32, %c0_i32_0 : i32, i32, i32
  }
  func.func @transform_1(%arg0: i32) -> (i32, i32, i32) {
    %c0_i32 = arith.constant 0 : i32
    %c0_i32_0 = arith.constant 0 : i32
    %c0_i32_1 = arith.constant 0 : i32
    %c0_i32_2 = arith.constant 0 : i32
    return %c0_i32, %c0_i32_0, %c0_i32_1 : i32, i32, i32
  }
  func.func @transform_2(%arg0: i32) -> (i32, i32) {
    %c0_i32 = arith.constant 0 : i32
    %c0_i32_0 = arith.constant 0 : i32
    %c0_i32_1 = arith.constant 0 : i32
    return %c0_i32, %c0_i32_0 : i32, i32
  }
  func.func @transform_3(%arg0: i32) -> (i32, i32, i32) {
    %c0_i32 = arith.constant 0 : i32
    %c0_i32_0 = arith.constant 0 : i32
    %c0_i32_1 = arith.constant 0 : i32
    %c0_i32_2 = arith.constant 0 : i32
    return %c0_i32, %c0_i32_0, %c0_i32_1 : i32, i32, i32
  }
  func.func @transform_4(%arg0: i32) -> (i32, i32) {
    %c0_i32 = arith.constant 0 : i32
    %c0_i32_0 = arith.constant 0 : i32
    %c0_i32_1 = arith.constant 0 : i32
    return %c0_i32, %c0_i32_0 : i32, i32
  }
  func.func @transform_5(%arg0: i32) -> (i32, i32, i32) {
    %c0_i32 = arith.constant 0 : i32
    %c0_i32_0 = arith.constant 0 : i32
    %c0_i32_1 = arith.constant 0 : i32
    return %arg0, %c0_i32, %c0_i32_0 : i32, i32, i32
  }
}

</mosaic_0001>

<bundles_post_ra>
// kernel: tpu_custom_call.1
= control target key start
LH: loop header
LB: loop body
LE: loop exit
PB: predicated region body
PF: predicated region fallthrough
CT: control target
= control target key end

     0   :  { %10 = vsyncpa [#allocation4], 0  ;;  %s1806_s0 = inlined_call_operand.hbm [shape: f32[2,16,128], index: 0, kind: input, shape index: {}]   ;;  %s1807_s1 = inlined_call_operand.hbm [shape: f32[3,128,128], index: 1, kind: input, shape index: {}]   ;;  %s1808_s2 = inlined_call_operand.vmem [shape: f32[1,128], index: 2, kind: input, shape index: {}]   ;;  %s1809_s3 = inlined_call_operand.hbm [shape: f32[3,128,128], index: 3, kind: input, shape index: {}]   ;;  %s1810_s4 = inlined_call_operand.vmem [shape: f32[1,128], index: 4, kind: input, shape index: {}]   ;;  %s1811_s5 = inlined_call_operand.hbm [shape: f32[2,16,128], index: 5, kind: output, shape index: {}]  }
   0x1   :  { %12 = vsyncpa [#allocation4 + $0x1], 0 }
   0x2   :  { %13 = vsyncpa [#allocation7], 0 }
   0x3   :  { %14 = vsyncpa [#allocation5], 0 }
   0x4   :  { %16 = vsyncpa [#allocation5 + $0x1], 0  ;;  %s1579_s18 = smov 0   ;;  %s1581_s19 = smov 0  }
   0x5   :  { %s1583_s20 = smov 0   ;;  %s1585_s21 = smov 0  }
   0x6 LB: > { %s1600_s22 = sadd.s32 4294967295, %s1538_s21   ;;  %s978_s23 = sadd.s32 4294967294, %s1538_s21   ;;  %s1538_s21 = sphi %s1585_s21, %s1834_s21   ;;  %s1534_s20 = sphi %s1583_s20, %s1833_s20   ;;  %s1530_s19 = sphi %s1581_s19, %s1832_s19   ;;  %s1526_s18 = sphi %s1579_s18, %s1831_s18  }
   0x7   : > { %p42_p0 = scmp.ne.s32.totalorder %s1530_s19, %s1526_s18  ;;  %p1812_p1 = scmp.eq.s32.totalorder %s1600_s22, 0 }
   0x8   : > { %p150_p2 = scmp.eq.s32.totalorder %s1600_s22, 1  ;;  %p156_p3 = scmp.eq.s32.totalorder %s978_s23, 1 }
   0x9   : > { %p1609_p4 = por %p1812_p1, %p42_p0  ;;  %p979_p5 = scmp.ge.s32.totalorder %s1538_s21, 1 }
   0xa   : > { %p1614_p6 = por %p156_p3, %p42_p0  ;;  %p163_p7 = scmp.lt.s32.totalorder %s1538_s21, 3 }
   0xb   : > { %s1817_s24 = scalar_select %p1609_p4, 1, 0 }
   0xc   : > { %s1818_s25 = scalar_select %p1614_p6, 1, 0 }
   0xd   : > { %p1619_p8 = pnand %p979_p5, %p163_p7  ;;  %s1540_s27 = smov [#allocation6]  }
   0xe   : > { %s175_s28 = sshll.u32 %s1540_s27, 4  ;;  %s1541_s30 = smov [#allocation8]   ;;  %s176_s28 = int_to_ptr.vmem [resolvable:$true] %s175_s28 }
   0xf   : > { %s1819_s26 = scalar_select %p1619_p8, 1, 0 }
  0x10   : > { %p1330_p9 = pneg %p1619_p8  ;;  %s191_s6 = sshll.u32 %s1541_s30, 4  ;;  %s192_s6 = int_to_ptr.vmem [resolvable:$true] %s191_s6 }
  0x11   : > { %s1401_s7 = scalar_lea.vmem %s176_s28, 6144  ;;  %p1409_p5 = scmp.lt.s32.totalorder %s176_s28, %s176_s28 }
  0x12   : > { %p1628_p11 = pnand %p1330_p9, %p1812_p1  ;;  %p1402_p13 = scmp.ne.s32.totalorder %s176_s28, %s1401_s7 }
  0x13   : > { %p1410_p7 = scmp.lt.s32.totalorder %s1401_s7, %s1401_s7 }
  0x14   : > { %p1392_p12 = pneg %p1628_p11 }
  0x15   : > { %p1411_p10 = por %p1410_p7, %p1409_p5 }
  0x16   : > { %p1404_p0 = pnand %p1402_p13, %p1392_p12 }
  0x18   : > { %p1405_p3 = pneg %p1404_p0 }
  0x1a   : > { %p1412_p9 = pnand %p1411_p10, %p1405_p3 }
  0x1c   : > { %1415 = shalt.err (!%p1412_p9)
}
  0x1d   : > { %s1813_s8 = smov 128   ;;  %s1543_s9 = smov 8  }
  0x1e   : > { %1333 = dma.hbm_to_vmem [thread:$0]  (!%p1628_p11), %s1807_s1, 6144, %s176_s28, [#allocation7], %s1813_s8, %s1813_s8, %s1543_s9  }
  0x1f   : > { %s1427_s12 = scalar_lea.vmem %s192_s6, 6144  ;;  %p1435_p10 = scmp.lt.s32.totalorder %s192_s6, %s192_s6 }
  0x20   : > { %p1428_p13 = scmp.ne.s32.totalorder %s192_s6, %s1427_s12  ;;  %p1436_p3 = scmp.lt.s32.totalorder %s1427_s12, %s1427_s12 }
  0x22   : > { %p1430_p0 = pnand %p1428_p13, %p1392_p12  ;;  %p1437_p7 = por %p1436_p3, %p1435_p10 }
  0x24   : > { %p1431_p5 = pneg %p1430_p0 }
  0x26   : > { %p1438_p9 = pnand %p1437_p7, %p1431_p5 }
  0x28   : > { %1441 = shalt.err (!%p1438_p9)
}
  0x29   : > { %1336 = dma.hbm_to_vmem [thread:$0]  (!%p1628_p11), %s1809_s3, 6144, %s192_s6, [#allocation7], %s1813_s8, %s1813_s8, %s1543_s9  }
  0x2a   : > { %s1657_s15 = sadd.s32 1, %s1538_s21   ;;  %s29_s16 = sadd.s32 1, %s1534_s20 }
  0x2b   : > { %s26_s17 = ssub.s32 %s1538_s21, %s1657_s15  ;;  %p36_p12 = scmp.ne.s32.totalorder %s1534_s20, %s1530_s19 }
  0x2c   : > { %p27_p13 = scmp.eq.s32.totalorder %s26_s17, 0  ;;  %p37_p0 = scmp.eq.s32.totalorder %s1538_s21, 0 }
  0x2d   : > { %p1667_p5 = por %p150_p2, %p36_p12  ;;  %p1347_p10 = scmp.lt.s32.totalorder %s1538_s21, 2 }
  0x2e   : > { %s1673_s27 = scalar_select %p27_p13, %s1534_s20, %s29_s16  }
  0x2f   : > { %s1821_s23 = scalar_select %p1667_p5, 1, 0 }
  0x30   : > { %p38_p3 = por %p37_p0, %p36_p12  ;;  %s208_s28 = sand.u32 1, %s1534_s20  }
  0x31   : > { %s983_s29 = sshll.u32 %s208_s28, 4  ;;  %s998_s30 = sshll.u32 %s1538_s21, 8 }
  0x32   : > { %s1680_s10 = scalar_lea.hbm %s1806_s0, %s998_s30  ;;  %s212_s11 = scalar_lea.vmem [#allocation3], %s983_s29 }
  0x33   : > { %s219_s12 = sshll.u32 %s212_s11, 4  ;;  %p1684_p2 = pnand %p1347_p10, %p38_p3  ;;  %s1682_s12 = int_to_ptr.vmem [resolvable:$true] %s219_s12 }
  0x34   : > { %s1688_s14 = scalar_lea.sflag [#allocation4], %s208_s28  ;;  %s1442_s16 = scalar_lea.hbm %s1680_s10, 256 }
  0x35   : > { %p1443_p11 = scmp.ne.s32.totalorder %s1680_s10, %s1442_s16  ;;  %p1444_p7 = pneg %p1684_p2 }
  0x36   : > { %s1447_s29 = scalar_lea.hbm %s1806_s0, 512  ;;  %p1448_p13 = scmp.lt.s32.totalorder %s1680_s10, %s1806_s0 }
  0x37   : > { %p1445_p9 = pnand %p1444_p7, %p1443_p11  ;;  %p1449_p0 = scmp.lt.s32.totalorder %s1447_s29, %s1442_s16 }
  0x39   : > { %p1446_p12 = pneg %p1445_p9  ;;  %p1450_p10 = por %p1449_p0, %p1448_p13 }
  0x3b   : > { %p1451_p3 = pnand %p1450_p10, %p1446_p12 }
  0x3d   : > { %1454 = shalt.err (!%p1451_p3)
}
  0x3e   : > { %s1455_s28 = scalar_lea.vmem %s1682_s12, 256  ;;  %s1544_s11 = smov [#allocation3]  }
  0x3f   : > { %p1456_p1 = scmp.ne.s32.totalorder %s1682_s12, %s1455_s28  ;;  %s1460_s8 = sshll.u32 %s1544_s11, 4  ;;  %s1461_s8 = int_to_ptr.vmem [resolvable:$false] %s1460_s8 }
  0x40   : > { %s1462_s17 = scalar_lea.vmem %s1461_s8, 512  ;;  %p1463_p9 = scmp.lt.s32.totalorder %s1682_s12, %s1461_s8 }
  0x41   : > { %p1458_p6 = pnand %p1456_p1, %p1444_p7  ;;  %p1464_p5 = scmp.lt.s32.totalorder %s1462_s17, %s1455_s28 }
  0x43   : > { %p1459_p11 = pneg %p1458_p6  ;;  %p1465_p4 = por %p1464_p5, %p1463_p9 }
  0x45   : > { %p1466_p8 = pnand %p1465_p4, %p1459_p11 }
  0x47   : > { %1469 = shalt.err (!%p1466_p8)
}
  0x48   : > { %s1823_s16 = smov 128   ;;  %p1824_p1 = scmp.ne.s32.totalorder %s1819_s26, 0 }
  0x49   : > { %1340 = dma.hbm_to_vmem [thread:$0]  (!%p1684_p2), %s1680_s10, 256, %s1682_s12, %s1688_s14, %s1823_s16, %s1823_s16, %s1543_s9  }
  0x4a   : > { %231 = sbr.rel (%p1824_p1) target bundleno = 600 (0x258), region = 40  ;;  %s1715_s30 = sand.u32 (!%p1824_p1), 1, %s1530_s19  }
  0x4b   : > { %s987_s8 = sshll.u32 (!%p1824_p1), %s1715_s30, 4  ;;  %s234_s29 = scalar_lea.sflag (!%p1824_p1), [#allocation4], %s1715_s30 }
  0x4c   : > { %s1721_s13 = scalar_lea.vmem (!%p1824_p1), [#allocation3], %s987_s8  ;;  %p1825_p4 = scmp.ne.s32.totalorder (!%p1824_p1), %s1817_s24, 0 }
  0x4f   : > { %1513 = dma.done.wait (%p1825_p4), %s234_s29, 256  }
  0x50   : > { %1515 = vsyncadd (%p1825_p4), %s234_s29, 4294967040  ;;  %p1826_p6 = scmp.eq.s32.totalorder %s1600_s22, 0 }
  0x52   : > { %1517 = dma.done.wait (%p1826_p6), [#allocation7], 12288   ;;  %p1827_p8 = pmov %p1826_p6 }
  0x53   : > { %v1545_v0 = vmov 0.0   ;;  %v316_v1 = vld [vmem:[#allocation6 + $0xf8] sm:$0xff]  ;;  %v315_v3 = vld [vmem:[#allocation6 + $0xf0] sm:$0xff]  ;;  %v314_v5 = vld [vmem:[#allocation6 + $0xe8] sm:$0xff]  ;;  %s271_s12 = scalar_lea.vmem [#allocation9], %s987_s8  ;;  %s999_s6 = sshll.u32 %s1600_s22, 8 }
  0x54   : > { %1519 = vsyncadd (%p1827_p8), [#allocation7], 4294955008  ;;  %272 = vst [vmem:[#allocation2 + $0x7] sm:$0x1] %v1545_v0  ;;  %v297_v2 = vld [vmem:[#allocation6 + $0x78] sm:$0xff]  ;;  %1108 = vmatprep.subr.mxu0 %v316_v1  ;;  %v296_v4 = vld [vmem:[#allocation6 + $0x70] sm:$0xff]  ;;  %s1762_s11 = scalar_lea.hbm %s1811_s5, %s999_s6 }
  0x55   : > { %273 = vst [vmem:[#allocation2 + $0x18] sm:$0x1] %v1545_v0  ;;  %1143 = vmatprep.subr.mxu1 %v297_v2  ;;  %1109 = vmatpush3.msra.mxu0 %v316_v1  ;;  %v295_v6 = vld [vmem:[#allocation6 + $0x68] sm:$0xff]  ;;  %v313_v7 = vld [vmem:[#allocation6 + $0xe0] sm:$0xff]  ;;  %v312_v9 = vld [vmem:[#allocation6 + $0xd8] sm:$0xff]  ;;  %s886_s14 = sshll.u32 %s271_s12, 4  ;;  %s1757_s14 = int_to_ptr.vmem [resolvable:$true] %s886_s14 }
  0x56   : > { %1144 = vmatpush3.msra.mxu1 %v297_v2  ;;  %1110 = vmatprep.subr.mxu0 %v315_v3  ;;  %v294_v8 = vld [vmem:[#allocation6 + $0x60] sm:$0xff]  ;;  %v293_v10 = vld [vmem:[#allocation6 + $0x58] sm:$0xff]  ;;  %v311_v11 = vld [vmem:[#allocation6 + $0xd0] sm:$0xff]  ;;  %s873_s17 = scalar_lea.sflag [#allocation5], %s1715_s30  ;;  %s1470_s16 = scalar_lea.vmem %s1757_s14, 256 }
  0x57   : > { %1145 = vmatprep.subr.mxu1 %v296_v4  ;;  %1111 = vmatpush3.msra.mxu0 %v315_v3  ;;  %v292_v12 = vld [vmem:[#allocation6 + $0x50] sm:$0xff]  ;;  %v310_v13 = vld [vmem:[#allocation6 + $0xc8] sm:$0xff]  ;;  %v309_v18 = vld [vmem:[#allocation6 + $0xc0] sm:$0xff]  ;;  %p1471_p5 = scmp.ne.s32.totalorder %s1757_s14, %s1470_s16  ;;  %p1828_p2 = scmp.ne.s32.totalorder %s1821_s23, 0 }
  0x58   : > { %1146 = vmatpush3.msra.mxu1 %v296_v4  ;;  %1112 = vmatprep.subr.mxu0 %v314_v5  ;;  %v291_v14 = vld [vmem:[#allocation6 + $0x48] sm:$0xff]  ;;  %v1732_v15 = vld [vmem:[%s1721_s13] sm:$0xff]  ;;  %v308_v21 = vld [vmem:[#allocation6 + $0xb8] sm:$0xff]  ;;  %s1546_s22 = smov [#allocation9]  }
  0x59   : > { %1147 = vmatprep.subr.mxu1 %v295_v6  ;;  %1113 = vmatpush3.msra.mxu0 %v314_v5  ;;  %v276_v16 = vmax.f32 %v1732_v15, 0.0  ;;  %v1736_v17 = vld [vmem:[%s1721_s13 + $0x8] sm:$0xff]  ;;  %v290_v19 = vld [vmem:[#allocation6 + $0x40] sm:$0xff]  ;;  %v307_v23 = vld [vmem:[#allocation6 + $0xb0] sm:$0xff]  ;;  %p1472_p7 = pnand %p1471_p5, %p1828_p2  ;;  %s1474_s8 = sshll.u32 %s1546_s22, 4  ;;  %s1475_s8 = int_to_ptr.vmem [resolvable:$false] %s1474_s8 }
  0x5a   : > { %1148 = vmatpush3.msra.mxu1 %v295_v6  ;;  %1114 = vmatprep.subr.mxu0 %v313_v7  ;;  %v277_v20 = vmax.f32 %v1736_v17, 0.0  ;;  %v289_v22 = vld [vmem:[#allocation6 + $0x38] sm:$0xff]  ;;  %v288_v24 = vld [vmem:[#allocation6 + $0x30] sm:$0xff]  ;;  %v306_v25 = vld [vmem:[#allocation6 + $0xa8] sm:$0xff]  ;;  %s1476_s29 = scalar_lea.vmem %s1475_s8, 512  ;;  %p1477_p13 = scmp.lt.s32.totalorder %s1757_s14, %s1475_s8 }
  0x5b   : > { %1149 = vmatprep.subr.mxu1 %v294_v8  ;;  %1115 = vmatpush3.msra.mxu0 %v313_v7  ;;  %278 = vst [vmem:[#allocation2 + $0x8] sm:$0xff] %v276_v16  ;;  %v287_v26 = vld [vmem:[#allocation6 + $0x28] sm:$0xff]  ;;  %v305_v27 = vld [vmem:[#allocation6 + $0xa0] sm:$0xff]  ;;  %v304_v29 = vld [vmem:[#allocation6 + $0x98] sm:$0xff]  ;;  %p1473_p12 = pneg %p1472_p7  ;;  %p1478_p0 = scmp.lt.s32.totalorder %s1476_s29, %s1470_s16 }
  0x5c   : > { %1150 = vmatpush3.msra.mxu1 %v294_v8  ;;  %1116 = vmatprep.subr.mxu0 %v312_v9  ;;  %279 = vst [vmem:[#allocation2 + $0x10] sm:$0xff] %v277_v20  ;;  %v286_v28 = vld [vmem:[#allocation6 + $0x20] sm:$0xff]  ;;  %v285_v30 = vld [vmem:[#allocation6 + $0x18] sm:$0xff]  ;;  %v303_v31 = vld [vmem:[#allocation6 + $0x90] sm:$0xff] }
  0x5d   : > { %1151 = vmatprep.subr.mxu1 %v293_v10  ;;  %1117 = vmatpush3.msra.mxu0 %v312_v9  ;;  %v284_v32 = vld [vmem:[#allocation6 + $0x10] sm:$0xff]  ;;  %v302_v33 = vld [vmem:[#allocation6 + $0x88] sm:$0xff]  ;;  %v301_v35 = vld [vmem:[#allocation6 + $0x80] sm:$0xff]  ;;  %p1479_p10 = por %p1478_p0, %p1477_p13 }
  0x5e   : > { %1152 = vmatpush3.msra.mxu1 %v293_v10  ;;  %1118 = vmatprep.subr.mxu0 %v311_v11  ;;  %v283_v34 = vld [vmem:[#allocation6 + $0x8] sm:$0xff]  ;;  %v282_v36 = vld [vmem:[#allocation6] sm:$0xff]  ;;  %v485_v39 = vld [vmem:[#allocation6 + $0x178] sm:$0xff] }
  0x5f   : > { %1153 = vmatprep.subr.mxu1 %v292_v12  ;;  %1119 = vmatpush3.msra.mxu0 %v311_v11  ;;  %v484_v41 = vld [vmem:[#allocation6 + $0x170] sm:$0xff]  ;;  %v483_v42 = vld [vmem:[#allocation6 + $0x168] sm:$0xff]  ;;  %v482_v43 = vld [vmem:[#allocation6 + $0x160] sm:$0xff]  ;;  %p1480_p3 = pnand %p1479_p10, %p1473_p12 }
  0x60   : > { %1154 = vmatpush3.msra.mxu1 %v292_v12  ;;  %1120 = vmatprep.subr.mxu0 %v310_v13  ;;  %v481_v44 = vld [vmem:[#allocation6 + $0x158] sm:$0xff]  ;;  %v480_v45 = vld [vmem:[#allocation6 + $0x150] sm:$0xff]  ;;  %v479_v46 = vld [vmem:[#allocation6 + $0x148] sm:$0xff] }
  0x61   : > { %1155 = vmatprep.subr.mxu1 %v291_v14  ;;  %1121 = vmatpush3.msra.mxu0 %v310_v13  ;;  %v478_v47 = vld [vmem:[#allocation6 + $0x140] sm:$0xff]  ;;  %v477_v48 = vld [vmem:[#allocation6 + $0x138] sm:$0xff]  ;;  %v476_v49 = vld [vmem:[#allocation6 + $0x130] sm:$0xff] }
  0x62   : > { %1156 = vmatpush3.msra.mxu1 %v291_v14  ;;  %1122 = vmatprep.subr.mxu0 %v309_v18  ;;  %v280_v37 = vld [vmem:[#allocation2 + $0x7] sm:$0xff]  ;;  %v473_v52 = vld [vmem:[#allocation6 + $0x118] sm:$0xff]  ;;  %v472_v53 = vld [vmem:[#allocation6 + $0x110] sm:$0xff] }
  0x63   : > { %1157 = vmatprep.subr.mxu1 %v290_v19  ;;  %1123 = vmatpush3.msra.mxu0 %v309_v18  ;;  %v281_v38 = vld [vmem:[#allocation2 + $0xf] sm:$0xff]  ;;  %v474_v51 = vld [vmem:[#allocation6 + $0x120] sm:$0xff]  ;;  %v612_v57 = vld [vmem:[#allocation8 + $0xf8] sm:$0xff] }
  0x64   : > { %1158 = vmatpush3.msra.mxu1 %v290_v19  ;;  %1124 = vmatprep.subr.mxu0 %v308_v21  ;;  %v467_v40 = vld [vmem:[#allocation2 + $0x9] sm:$0xff]  ;;  %v470_v55 = vld [vmem:[#allocation6 + $0x100] sm:$0xff]  ;;  %v468_v56 = vld [vmem:[#allocation2 + $0x11] sm:$0xff] }
  0x65   : > { %1159 = vmatprep.subr.mxu1 %v289_v22  ;;  %1125 = vmatpush3.msra.mxu0 %v308_v21  ;;  %v475_v50 = vld [vmem:[#allocation6 + $0x128] sm:$0xff]  ;;  %v593_v58 = vld [vmem:[#allocation8 + $0x78] sm:$0xff]  ;;  %v611_v59 = vld [vmem:[#allocation8 + $0xf0] sm:$0xff] }
  0x66   : > { %1160 = vmatpush3.msra.mxu1 %v289_v22  ;;  %1126 = vmatprep.subr.mxu0 %v307_v23  ;;  %v471_v54 = vld [vmem:[#allocation6 + $0x108] sm:$0xff]  ;;  %v592_v60 = vld [vmem:[#allocation8 + $0x70] sm:$0xff]  ;;  %v609_v63 = vld [vmem:[#allocation8 + $0xe0] sm:$0xff] }
  0x67   : > { %1161 = vmatprep.subr.mxu1 %v288_v24  ;;  %1127 = vmatpush3.msra.mxu0 %v307_v23  ;;  %v610_v61 = vld [vmem:[#allocation8 + $0xe8] sm:$0xff]  ;;  %v590_v0 = vld [vmem:[#allocation8 + $0x60] sm:$0xff]  ;;  %v608_v1 = vld [vmem:[#allocation8 + $0xd8] sm:$0xff] }
  0x68   : > { %1162 = vmatpush3.msra.mxu1 %v288_v24  ;;  %1128 = vmatprep.subr.mxu0 %v306_v25  ;;  %v591_v62 = vld [vmem:[#allocation8 + $0x68] sm:$0xff]  ;;  %v589_v2 = vld [vmem:[#allocation8 + $0x58] sm:$0xff]  ;;  %v607_v3 = vld [vmem:[#allocation8 + $0xd0] sm:$0xff] }
  0x69   : > { %1163 = vmatprep.subr.mxu1 %v287_v26  ;;  %1129 = vmatpush3.msra.mxu0 %v306_v25  ;;  %v588_v4 = vld [vmem:[#allocation8 + $0x50] sm:$0xff]  ;;  %v606_v5 = vld [vmem:[#allocation8 + $0xc8] sm:$0xff]  ;;  %v605_v7 = vld [vmem:[#allocation8 + $0xc0] sm:$0xff] }
  0x6a   : > { %1164 = vmatpush3.msra.mxu1 %v287_v26  ;;  %1130 = vmatprep.subr.mxu0 %v305_v27  ;;  %v587_v6 = vld [vmem:[#allocation8 + $0x48] sm:$0xff]  ;;  %v604_v8 = vld [vmem:[#allocation8 + $0xb8] sm:$0xff]  ;;  %v603_v9 = vld [vmem:[#allocation8 + $0xb0] sm:$0xff] }
  0x6b   : > { %1165 = vmatprep.subr.mxu1 %v286_v28  ;;  %1131 = vmatpush3.msra.mxu0 %v305_v27  ;;  %v602_v10 = vld [vmem:[#allocation8 + $0xa8] sm:$0xff]  ;;  %v601_v11 = vld [vmem:[#allocation8 + $0xa0] sm:$0xff]  ;;  %v600_v13 = vld [vmem:[#allocation8 + $0x98] sm:$0xff] }
  0x6c   : > { %1166 = vmatpush3.msra.mxu1 %v286_v28  ;;  %1132 = vmatprep.subr.mxu0 %v304_v29  ;;  %v586_v12 = vld [vmem:[#allocation8 + $0x40] sm:$0xff]  ;;  %v585_v14 = vld [vmem:[#allocation8 + $0x38] sm:$0xff]  ;;  %v584_v18 = vld [vmem:[#allocation8 + $0x30] sm:$0xff] }
  0x6d   : > { %1167 = vmatprep.subr.mxu1 %v285_v30  ;;  %1133 = vmatpush3.msra.mxu0 %v304_v29  ;;  %v598_v19 = vld [vmem:[#allocation8 + $0x88] sm:$0xff]  ;;  %v597_v21 = vld [vmem:[#allocation8 + $0x80] sm:$0xff]  ;;  %v781_v23 = vld [vmem:[#allocation8 + $0x178] sm:$0xff] }
  0x6e   : > { %1168 = vmatpush3.msra.mxu1 %v285_v30  ;;  %1134 = vmatprep.subr.mxu0 %v303_v31  ;;  %v582_v22 = vld [vmem:[#allocation8 + $0x20] sm:$0xff]  ;;  %v581_v24 = vld [vmem:[#allocation8 + $0x18] sm:$0xff]  ;;  %v580_v25 = vld [vmem:[#allocation8 + $0x10] sm:$0xff] }
  0x6f   : > { %1169 = vmatprep.subr.mxu1 %v284_v32  ;;  %1135 = vmatpush3.msra.mxu0 %v303_v31  ;;  %v579_v26 = vld [vmem:[#allocation8 + $0x8] sm:$0xff]  ;;  %v578_v27 = vld [vmem:[#allocation8] sm:$0xff] }
  0x70   : > { %1170 = vmatpush3.msra.mxu1 %v284_v32  ;;  %1136 = vmatprep.subr.mxu0 %v302_v33 }
  0x71   : > { %1171 = vmatprep.subr.mxu1 %v283_v34  ;;  %1137 = vmatpush3.msra.mxu0 %v302_v33 }
  0x72   : > { %1172 = vmatpush3.msra.mxu1 %v283_v34  ;;  %1138 = vmatprep.subr.mxu0 %v301_v35  ;;  %v991_v34 = vld [vmem:[%s1808_s2] ss:$0 sm:$0xff] }
  0x73   : > { %1173 = vmatprep.subr.mxu1 %v282_v36  ;;  %1139 = vmatpush3.msra.mxu0 %v301_v35 }
  0x74   : > { %1140 = vmatprep.mubr.f32.mxu0 %v276_v16  ;;  %1174 = vmatpush3.msra.mxu1 %v282_v36  ;;  %v599_v16 = vld [vmem:[#allocation8 + $0x90] sm:$0xff] }
  0x75   : > { %1175 = vmatprep.mubr.f32.mxu1 %v280_v37  ;;  %1141 = vmatmul.mubr.f32.vlgmr.msra.gmra.mxu0 %v277_v20  ;;  %v583_v20 = vld [vmem:[#allocation8 + $0x28] sm:$0xff] }
  0x76   : > { %1176 = vmatmul.mubr.f32.vlgmr.msra.gmra.mxu1 %v281_v38  ;;  %1178 = vmatprep.subr.mxu0 %v485_v39 }
  0x77   : > { %1210 = vmatprep.mubr.f32.mxu0 %v467_v40  ;;  %1179 = vmatpush3.msra.mxu0 %v485_v39 }
  0x78   : > { %1180 = vmatprep.subr.mxu0 %v484_v41  ;;  %1213 = vmatprep.subr.mxu1 %v612_v57 }
  0x79   : > { %1181 = vmatpush3.msra.mxu0 %v484_v41  ;;  %1214 = vmatpush3.msra.mxu1 %v612_v57  ;;  %v769_v57 = vld [vmem:[#allocation8 + $0x118] sm:$0xff] }
  0x7a   : > { %1182 = vmatprep.subr.mxu0 %v483_v42  ;;  %1215 = vmatprep.subr.mxu1 %v611_v59 }
  0x7b   : > { %1183 = vmatpush3.msra.mxu0 %v483_v42  ;;  %1216 = vmatpush3.msra.mxu1 %v611_v59  ;;  %v767_v59 = vld [vmem:[#allocation8 + $0x108] sm:$0xff] }
  0x7c   : > { %1184 = vmatprep.subr.mxu0 %v482_v43  ;;  %1217 = vmatprep.subr.mxu1 %v610_v61 }
  0x7d   : > { %1185 = vmatpush3.msra.mxu0 %v482_v43  ;;  %1218 = vmatpush3.msra.mxu1 %v610_v61  ;;  %v780_v43 = vld [vmem:[#allocation8 + $0x170] sm:$0xff] }
  0x7e   : > { %1186 = vmatprep.subr.mxu0 %v481_v44  ;;  %1219 = vmatprep.subr.mxu1 %v609_v63 }
  0x7f   : > { %1187 = vmatpush3.msra.mxu0 %v481_v44  ;;  %1220 = vmatpush3.msra.mxu1 %v609_v63  ;;  %v779_v44 = vld [vmem:[#allocation8 + $0x168] sm:$0xff] }
  0x80   : > { %1188 = vmatprep.subr.mxu0 %v480_v45  ;;  %1221 = vmatprep.subr.mxu1 %v608_v1 }
  0x81   : > { %1189 = vmatpush3.msra.mxu0 %v480_v45  ;;  %1222 = vmatpush3.msra.mxu1 %v608_v1  ;;  %v778_v45 = vld [vmem:[#allocation8 + $0x160] sm:$0xff] }
  0x82   : > { %1190 = vmatprep.subr.mxu0 %v479_v46  ;;  %1223 = vmatprep.subr.mxu1 %v607_v3 }
  0x83   : > { %1191 = vmatpush3.msra.mxu0 %v479_v46  ;;  %1224 = vmatpush3.msra.mxu1 %v607_v3  ;;  %v777_v46 = vld [vmem:[#allocation8 + $0x158] sm:$0xff] }
  0x84   : > { %1192 = vmatprep.subr.mxu0 %v478_v47  ;;  %1225 = vmatprep.subr.mxu1 %v606_v5 }
  0x85   : > { %1193 = vmatpush3.msra.mxu0 %v478_v47  ;;  %1226 = vmatpush3.msra.mxu1 %v606_v5 }
  0x86   : > { %1194 = vmatprep.subr.mxu0 %v477_v48  ;;  %1227 = vmatprep.subr.mxu1 %v605_v7 }
  0x87   : > { %1195 = vmatpush3.msra.mxu0 %v477_v48  ;;  %1228 = vmatpush3.msra.mxu1 %v605_v7 }
  0x88   : > { %1196 = vmatprep.subr.mxu0 %v476_v49  ;;  %1229 = vmatprep.subr.mxu1 %v604_v8 }
  0x89   : > { %1197 = vmatpush3.msra.mxu0 %v476_v49  ;;  %1230 = vmatpush3.msra.mxu1 %v604_v8 }
  0x8a   : > { %1198 = vmatprep.subr.mxu0 %v475_v50  ;;  %1231 = vmatprep.subr.mxu1 %v603_v9 }
  0x8b   : > { %1199 = vmatpush3.msra.mxu0 %v475_v50  ;;  %1232 = vmatpush3.msra.mxu1 %v603_v9  ;;  %v776_v50 = vld [vmem:[#allocation8 + $0x150] sm:$0xff] }
  0x8c   : > { %1200 = vmatprep.subr.mxu0 %v474_v51  ;;  %1233 = vmatprep.subr.mxu1 %v602_v10 }
  0x8d   : > { %1201 = vmatpush3.msra.mxu0 %v474_v51  ;;  %1234 = vmatpush3.msra.mxu1 %v602_v10  ;;  %v775_v51 = vld [vmem:[#allocation8 + $0x148] sm:$0xff] }
  0x8e   : > { %1202 = vmatprep.subr.mxu0 %v473_v52  ;;  %1235 = vmatprep.subr.mxu1 %v601_v11 }
  0x8f   : > { %1203 = vmatpush3.msra.mxu0 %v473_v52  ;;  %1236 = vmatpush3.msra.mxu1 %v601_v11  ;;  %v774_v52 = vld [vmem:[#allocation8 + $0x140] sm:$0xff] }
  0x90   : > { %1204 = vmatprep.subr.mxu0 %v472_v53  ;;  %1237 = vmatprep.subr.mxu1 %v600_v13 }
  0x91   : > { %1205 = vmatpush3.msra.mxu0 %v472_v53  ;;  %1238 = vmatpush3.msra.mxu1 %v600_v13  ;;  %v773_v53 = vld [vmem:[#allocation8 + $0x138] sm:$0xff] }
  0x92   : > { %1206 = vmatprep.subr.mxu0 %v471_v54  ;;  %1239 = vmatprep.subr.mxu1 %v599_v16 }
  0x93   : > { %1207 = vmatpush3.msra.mxu0 %v471_v54  ;;  %1240 = vmatpush3.msra.mxu1 %v599_v16  ;;  %v772_v54 = vld [vmem:[#allocation8 + $0x130] sm:$0xff] }
  0x94   : > { %1208 = vmatprep.subr.mxu0 %v470_v55  ;;  %1241 = vmatprep.subr.mxu1 %v598_v19 }
  0x95   : > { %1209 = vmatpush3.msra.mxu0 %v470_v55  ;;  %1242 = vmatpush3.msra.mxu1 %v598_v19  ;;  %v771_v55 = vld [vmem:[#allocation8 + $0x128] sm:$0xff] }
  0x96   : > { %1211 = vmatmul.mubr.f32.vlgmr.msra.gmra.mxu0 %v468_v56  ;;  %1248 = vmatprep.subr.mxu0 %v593_v58  ;;  %v770_v56 = vld [vmem:[#allocation8 + $0x120] sm:$0xff] }
  0x97   : > { %1249 = vmatpush3.msra.mxu0 %v593_v58  ;;  %1243 = vmatprep.subr.mxu1 %v597_v21  ;;  %v768_v58 = vld [vmem:[#allocation8 + $0x110] sm:$0xff] }
  0x98   : > { %1250 = vmatprep.subr.mxu0 %v592_v60  ;;  %1244 = vmatpush3.msra.mxu1 %v597_v21 }
  0x99   : > { %1251 = vmatpush3.msra.mxu0 %v592_v60  ;;  %1283 = vmatprep.subr.mxu1 %v781_v23  ;;  %v766_v60 = vld [vmem:[#allocation8 + $0x100] sm:$0xff] }
  0x9a   : > { %1252 = vmatprep.subr.mxu0 %v591_v62 }
  0x9b   : > { %1253 = vmatpush3.msra.mxu0 %v591_v62 }
  0x9c   : > { %1254 = vmatprep.subr.mxu0 %v590_v0 }
  0x9d   : > { %1255 = vmatpush3.msra.mxu0 %v590_v0 }
  0x9e   : > { %1256 = vmatprep.subr.mxu0 %v589_v2 }
  0x9f   : > { %1257 = vmatpush3.msra.mxu0 %v589_v2 }
  0xa0   : > { %1258 = vmatprep.subr.mxu0 %v588_v4 }
  0xa1   : > { %1259 = vmatpush3.msra.mxu0 %v588_v4  ;;  %v992_v4 = vld [vmem:[%s1810_s4] ss:$0 sm:$0xff] }
  0xa2   : > { %1260 = vmatprep.subr.mxu0 %v587_v6 }
  0xa3   : > { %1261 = vmatpush3.msra.mxu0 %v587_v6 }
  0xa4   : > { %1262 = vmatprep.subr.mxu0 %v586_v12 }
  0xa5   : > { %1263 = vmatpush3.msra.mxu0 %v586_v12 }
  0xa6   : > { %1264 = vmatprep.subr.mxu0 %v585_v14 }
  0xa7   : > { %1265 = vmatpush3.msra.mxu0 %v585_v14 }
  0xa8   : > { %1266 = vmatprep.subr.mxu0 %v584_v18 }
  0xa9   : > { %1267 = vmatpush3.msra.mxu0 %v584_v18 }
  0xaa   : > { %1268 = vmatprep.subr.mxu0 %v583_v20 }
  0xab   : > { %1269 = vmatpush3.msra.mxu0 %v583_v20 }
  0xac   : > { %1270 = vmatprep.subr.mxu0 %v582_v22 }
  0xad   : > { %1271 = vmatpush3.msra.mxu0 %v582_v22 }
  0xae   : > { %1272 = vmatprep.subr.mxu0 %v581_v24 }
  0xaf   : > { %1273 = vmatpush3.msra.mxu0 %v581_v24 }
  0xb0   : > { %1274 = vmatprep.subr.mxu0 %v580_v25 }
  0xb1   : > { %1275 = vmatpush3.msra.mxu0 %v580_v25 }
  0xb2   : > { %1276 = vmatprep.subr.mxu0 %v579_v26 }
  0xb3   : > { %1277 = vmatpush3.msra.mxu0 %v579_v26 }
  0xb4   : > { %1278 = vmatprep.subr.mxu0 %v578_v27 }
  0xb5   : > { %1279 = vmatpush3.msra.mxu0 %v578_v27 }
 0x135   : > { %v1142_v28 = vpop.f32.mrf.mxu0 }
 0x136   : > { %v1177_v29 = vpop.f32.mrf.mxu1 }
 0x137   : > { %v383_v30 = vpop.f32.mrf.mxu0  ;;  %v464_v32 = vadd.f32 %v1177_v29, %v1142_v28 }
 0x138   : > { %v458_v31 = vpop.f32.mrf.mxu1 }
 0x139   : > { %v459_v35 = vadd.f32 %v458_v31, %v383_v30 }
 0x156   : > { %v1212_v33 = vpop.f32.mrf.mxu0 }
 0x157   : > { %v562_v36 = vadd.f32 %v1212_v33, %v464_v32 }
 0x158   : > { %v552_v37 = vpop.f32.mrf.mxu0 }
 0x159   : > { %v571_v38 = vadd.f32 %v991_v34, %v562_v36  ;;  %v561_v39 = vadd.f32 %v552_v37, %v459_v35 }
 0x15b   : > { %v573_v40 = vmax.f32 %v571_v38, 0.0  ;;  %v570_v41 = vadd.f32 %v991_v34, %v561_v39 }
 0x15d   : > { %575 = vst [vmem:[#allocation2 + $0x10] sm:$0xff] %v573_v40  ;;  %v572_v42 = vmax.f32 %v570_v41, 0.0 }
 0x15f   : > { %574 = vst [vmem:[#allocation2 + $0x8] sm:$0xff] %v572_v42  ;;  %1245 = vmatprep.mubr.f32.mxu1 %v572_v42 }
 0x160   : > { %1246 = vmatmul.mubr.f32.vlgmr.msra.gmra.mxu1 %v573_v40 }
 0x161   : > { %1284 = vmatpush3.msra.mxu1 %v781_v23 }
 0x162   : > { %1285 = vmatprep.subr.mxu1 %v780_v43 }
 0x163   : > { %1286 = vmatpush3.msra.mxu1 %v780_v43 }
 0x164   : > { %1287 = vmatprep.subr.mxu1 %v779_v44  ;;  %v764_v61 = vld [vmem:[#allocation2 + $0x11] sm:$0xff] }
 0x165   : > { %1288 = vmatpush3.msra.mxu1 %v779_v44 }
 0x166   : > { %v576_v47 = vld [vmem:[#allocation2 + $0x7] sm:$0xff]  ;;  %v577_v48 = vld [vmem:[#allocation2 + $0xf] sm:$0xff]  ;;  %1289 = vmatprep.subr.mxu1 %v778_v45 }
 0x167   : > { %v763_v49 = vld [vmem:[#allocation2 + $0x9] sm:$0xff]  ;;  %1280 = vmatprep.mubr.f32.mxu0 %v576_v47  ;;  %1290 = vmatpush3.msra.mxu1 %v778_v45 }
 0x168   : > { %1315 = vmatprep.mubr.f32.mxu1 %v763_v49  ;;  %1281 = vmatmul.mubr.f32.vlgmr.msra.gmra.mxu0 %v577_v48 }
 0x169   : > { %1291 = vmatprep.subr.mxu1 %v777_v46 }
 0x16a   : > { %1292 = vmatpush3.msra.mxu1 %v777_v46 }
 0x16b   : > { %1293 = vmatprep.subr.mxu1 %v776_v50 }
 0x16c   : > { %1294 = vmatpush3.msra.mxu1 %v776_v50 }
 0x16d   : > { %1295 = vmatprep.subr.mxu1 %v775_v51 }
 0x16e   : > { %1296 = vmatpush3.msra.mxu1 %v775_v51 }
 0x16f   : > { %1297 = vmatprep.subr.mxu1 %v774_v52 }
 0x170   : > { %1298 = vmatpush3.msra.mxu1 %v774_v52 }
 0x171   : > { %1299 = vmatprep.subr.mxu1 %v773_v53 }
 0x172   : > { %1300 = vmatpush3.msra.mxu1 %v773_v53 }
 0x173   : > { %1301 = vmatprep.subr.mxu1 %v772_v54 }
 0x174   : > { %1302 = vmatpush3.msra.mxu1 %v772_v54 }
 0x175   : > { %1303 = vmatprep.subr.mxu1 %v771_v55 }
 0x176   : > { %1304 = vmatpush3.msra.mxu1 %v771_v55 }
 0x177   : > { %1305 = vmatprep.subr.mxu1 %v770_v56 }
 0x178   : > { %1306 = vmatpush3.msra.mxu1 %v770_v56 }
 0x179   : > { %1307 = vmatprep.subr.mxu1 %v769_v57 }
 0x17a   : > { %1308 = vmatpush3.msra.mxu1 %v769_v57 }
 0x17b   : > { %1309 = vmatprep.subr.mxu1 %v768_v58 }
 0x17c   : > { %1310 = vmatpush3.msra.mxu1 %v768_v58 }
 0x17d   : > { %1311 = vmatprep.subr.mxu1 %v767_v59 }
 0x17e   : > { %1312 = vmatpush3.msra.mxu1 %v767_v59 }
 0x17f   : > { %1313 = vmatprep.subr.mxu1 %v766_v60 }
 0x180   : > { %1314 = vmatpush3.msra.mxu1 %v766_v60 }
 0x181   : > { %1316 = vmatmul.mubr.f32.vlgmr.msra.gmra.mxu1 %v764_v61 }
 0x220   : > { %v1247_v62 = vpop.f32.mrf.mxu1 }
 0x222   : > { %v679_v0 = vpop.f32.mrf.mxu1 }
 0x228   : > { %v1282_v63 = vpop.f32.mrf.mxu0 }
 0x229   : > { %v760_v2 = vadd.f32 %v1282_v63, %v1247_v62 }
 0x22a   : > { %v754_v1 = vpop.f32.mrf.mxu0 }
 0x22b   : > { %v755_v5 = vadd.f32 %v754_v1, %v679_v0 }
 0x241   : > { %v1317_v3 = vpop.f32.mrf.mxu1 }
 0x242   : > { %v858_v6 = vadd.f32 %v1317_v3, %v760_v2 }
 0x243   : > { %v848_v7 = vpop.f32.mrf.mxu1 }
 0x244   : > { %v867_v8 = vadd.f32 %v992_v4, %v858_v6  ;;  %v857_v9 = vadd.f32 %v848_v7, %v755_v5 }
 0x246   : > { %v869_v10 = vadd.f32 %v867_v8, %v1736_v17  ;;  %v866_v11 = vadd.f32 %v992_v4, %v857_v9 }
 0x248   : > { %871 = vst [vmem:[%s271_s12 + $0x8] sm:$0xff] %v869_v10  ;;  %v868_v12 = vadd.f32 %v866_v11, %v1732_v15 }
 0x24a   : > { %870 = vst [vmem:[%s271_s12] sm:$0xff] %v868_v12 }
 0x24b   : > { %1483 = shalt.err (!%p1480_p3)
}
 0x24c   : > { %s1484_s13 = scalar_lea.hbm %s1762_s11, 256  ;;  %s1488_s9 = scalar_lea.hbm %s1811_s5, 512 }
 0x24d   : > { %p1485_p11 = scmp.ne.s32.totalorder %s1762_s11, %s1484_s13  ;;  %p1489_p4 = scmp.lt.s32.totalorder %s1762_s11, %s1811_s5 }
 0x24e   : > { %p1490_p6 = scmp.lt.s32.totalorder %s1488_s9, %s1484_s13 }
 0x24f   : > { %p1486_p9 = pnand %p1485_p11, %p1828_p2 }
 0x250   : > { %p1491_p8 = por %p1490_p6, %p1489_p4 }
 0x251   : > { %p1487_p1 = pneg %p1486_p9 }
 0x253   : > { %p1492_p5 = pnand %p1491_p8, %p1487_p1 }
 0x255   : > { %1495 = shalt.err (!%p1492_p5)
}
 0x256   : > { %s1547_s6 = smov 128   ;;  %s1548_s7 = smov 8  }
 0x257   : > { %1328 = dma.vmem_to_hbm [thread:$0]  (%p1828_p2), %s1757_s14, 256, %s1762_s11, %s873_s17, %s1547_s6, %s1547_s6, %s1548_s7  }
 0x258 PF: > { %s901_s28 = sand.u32 1, %s1526_s18   ;;  %p1829_p7 = scmp.ne.s32.totalorder %s1818_s25, 0 }
 0x259   : > { %p1830_p12 = scmp.ge.s32.totalorder %s1538_s21, 2  ;;  %s902_s16 = scalar_lea.sflag [#allocation5], %s901_s28 }
 0x25b   : > { %p1342_p13 = pnand %p1830_p12, %p1829_p7 }
 0x25d   : > { %p1343_p0 = pneg %p1342_p13 }
 0x25f   : > { %1521 = dma.done.wait (%p1343_p0), %s902_s16, 256  }
 0x260   : > { %1523 = vsyncadd (%p1343_p0), %s902_s16, 4294967040  ;;  %p19_p10 = scmp.ge.s32.totalorder %s1657_s15, 4   ;;  %s1831_s18 = smov %s1530_s19 }
 0x261   : > { %s1832_s19 = smov %s1534_s20  ;;  %s1833_s20 = smov %s1673_s27 }
 0x262   : > { %s1834_s21 = smov %s1657_s15  ;;  %21 = sbr.rel (!%p19_p10) target bundleno = 6 (0x6), region = 97 }
 0x267   :  { %907 = vsyncpa [#allocation4], 1 }
 0x268   :  { %909 = vsyncpa [#allocation4 + $0x1], 1 }
 0x269   :  { %910 = vsyncpa [#allocation7], 1 }
 0x26a   :  { %911 = vsyncpa [#allocation5], 1 }
 0x26b   :  { %913 = vsyncpa [#allocation5 + $0x1], 1 }

</bundles_post_ra>
